<compile_context>
chip_gen: v7x
topology: tpu7x:2x2x1
jax: 0.10.0
libtpu: 0.0.40
codegen_flags: <defaults>
</compile_context>

<pallas_src>
import math
from functools import partial

import jax
import jax.numpy as jnp
from jax.experimental import pallas as pl
from jax.experimental.pallas import tpu as pltpu


# ----------------------------------------------------------------------------
# Generation-aware knobs
# ----------------------------------------------------------------------------
def _vmem_limit_bytes():
    """~3/4 of physical VMEM: 96 MiB on 128 MiB v5e/v6e, 48 MiB on 64 MiB v7x."""
    try:
        cap = int(pltpu.get_tpu_info().vmem_capacity_bytes)
    except Exception:
        cap = 64 * 1024 * 1024          # conservative fallback (v7x-sized)
    return min((cap * 3) // 4, 100 * 1024 * 1024)


VMEM_LIMIT = _vmem_limit_bytes()
ROW_TILE_TARGET = 512                   # ~85% of HBM roofline vs ~63% at 256-row tiles
COL_TILE_TARGET = 512                   # FFN intermediate-dim streaming tile


def _cparams(semantics):
    return pltpu.CompilerParams(dimension_semantics=semantics,
                                vmem_limit_bytes=VMEM_LIMIT)


def _round_up(x, m):
    return ((x + m - 1) // m) * m


def _row_tile(m, target=ROW_TILE_TARGET):
    """Row tile (multiple of 8) <= target; callers pad rows up to a multiple of it."""
    if m <= target:
        return _round_up(m, 8)
    for t in range(target, 7, -8):
        if m % t == 0:
            return t
    return target                        # padded last tile instead of a whole-array block


def _col_tile(n, target=COL_TILE_TARGET):
    """Column tile (multiple of 128) dividing n, or n itself."""
    if n <= target:
        return n
    for t in range(target - target % 128, 127, -128):
        if n % t == 0:
            return t
    return n


def _pad_rows(x2, tm):
    m = x2.shape[0]
    mp = _round_up(m, tm)
    if mp != m:
        x2 = jnp.pad(x2, ((0, mp - m), (0, 0)))
    return x2, mp


# ----------------------------------------------------------------------------
# Single-buffering of grid-invariant (weight) blocks
# ----------------------------------------------------------------------------
_BUFFERED_ONE = None


def _single_buffer_ok():
    """Probe whether pipeline_mode=pl.Buffered(1) compiles & runs on this jax/TPU."""
    global _BUFFERED_ONE
    if _BUFFERED_ONE is None:
        try:
            def _k(x_ref, o_ref):
                o_ref[...] = x_ref[...] + 1.0
            out = pl.pallas_call(
                _k,
                out_shape=jax.ShapeDtypeStruct((8, 128), jnp.float32),
                grid=(1,),
                in_specs=[pl.BlockSpec((8, 128), lambda i: (0, 0),
                                       pipeline_mode=pl.Buffered(1))],
                out_specs=pl.BlockSpec((8, 128), lambda i: (0, 0)),
            )(jnp.zeros((8, 128), jnp.float32))
            jax.block_until_ready(out)
            _BUFFERED_ONE = True
        except Exception:
            _BUFFERED_ONE = False
    return _BUFFERED_ONE


def _const_spec(shape):
    """BlockSpec for a grid-invariant block (weights / biases / LN params).

    Single-buffered when supported so constant weights are not double-buffered
    out of the scoped-VMEM budget for zero benefit."""
    idx = lambda *_: (0,) * len(shape)
    if _single_buffer_ok():
        return pl.BlockSpec(shape, idx, pipeline_mode=pl.Buffered(1))
    return pl.BlockSpec(shape, idx)


# ----------------------------------------------------------------------------
# Pallas kernels
# ----------------------------------------------------------------------------
def _ln_kernel(x_ref, g_ref, b_ref, o_ref, *, eps):
    x = x_ref[...]
    mean = jnp.mean(x, axis=-1, keepdims=True)
    xc = x - mean
    var = jnp.mean(xc * xc, axis=-1, keepdims=True)
    inv = jax.lax.rsqrt(var + eps)
    o_ref[...] = (xc * inv * g_ref[...] + b_ref[...]).astype(o_ref.dtype)


def _attn_layer_kernel(x_ref, mask_ref, wqkv_ref, bqkv_ref, wo_ref, bo_ref,
                       g_ref, be_ref, o_ref, *, nh, dh, eps):
    """Fused per-example attention block: QKV proj -> per-head softmax(QK^T)V ->
    single out-projection -> +residual -> LayerNorm.  All intermediates stay in
    VMEM in lane-dense (S, *) layouts; nothing head-major ever reaches HBM."""
    H = nh * dh
    x = x_ref[0]                                            # (S, H) f32 residual
    xb = x.astype(jnp.bfloat16)
    # fused QKV projection; the 1/sqrt(dh) scale is pre-folded into the Q columns of wqkv
    qkv = jnp.dot(xb, wqkv_ref[...],
                  preferred_element_type=jnp.float32) + bqkv_ref[...]   # (S, 3H) f32
    qkvb = qkv.astype(jnp.bfloat16)
    mask = mask_ref[0]                                      # (1, S) additive bias
    ctx_heads = []
    for h in range(nh):                                     # static unroll over heads
        qh = qkvb[:, h * dh:(h + 1) * dh]
        kh = qkvb[:, H + h * dh:H + (h + 1) * dh]
        vh = qkvb[:, 2 * H + h * dh:2 * H + (h + 1) * dh]
        s = jax.lax.dot_general(qh, kh, (((1,), (1,)), ((), ())),
                                preferred_element_type=jnp.float32)     # q @ k^T, (S,S)
        s = s + mask
        s = s - jnp.max(s, axis=-1, keepdims=True)
        p = jnp.exp(s)
        denom = jnp.sum(p, axis=-1, keepdims=True)
        p = p * pl.reciprocal(denom, approx=True)           # EUP divide, frees the VALU
        ctx_heads.append(jnp.dot(p.astype(jnp.bfloat16), vh,
                                 preferred_element_type=jnp.float32))   # (S, dh)
    # lane-dense (S, H) context -> one K=H out-projection matmul (full MXU depth)
    ctx = jnp.concatenate(ctx_heads, axis=-1).astype(jnp.bfloat16)
    out = jnp.dot(ctx, wo_ref[...], preferred_element_type=jnp.float32) + bo_ref[...]
    xr = out + x
    mean = jnp.mean(xr, axis=-1, keepdims=True)
    xc = xr - mean
    var = jnp.mean(xc * xc, axis=-1, keepdims=True)
    inv = jax.lax.rsqrt(var + eps)
    o_ref[0] = (xc * inv * g_ref[...] + be_ref[...]).astype(o_ref.dtype)


def _ffn_ln_kernel(x_ref, wi_ref, bi_ref, wf_ref, bf_ref, g_ref, be_ref,
                   o_ref, acc_ref, *, eps):
    """Fused FFN: x @ wi -> gelu -> @ wf (K-streamed over the intermediate dim into an
    f32 VMEM accumulator) -> + bias + residual -> LayerNorm at the last K step."""
    k = pl.program_id(1)

    @pl.when(k == 0)
    def _():
        acc_ref[...] = jnp.zeros_like(acc_ref)

    xb = x_ref[...].astype(jnp.bfloat16)
    h1 = jnp.dot(xb, wi_ref[...], preferred_element_type=jnp.float32) + bi_ref[...]
    # TODO(synk): HF BERT default is exact erf-GELU; tanh approximation used here.
    h1 = 0.5 * h1 * (1.0 + jnp.tanh(0.7978845608028654 * (h1 + 0.044715 * h1 * h1 * h1)))
    acc_ref[...] += jnp.dot(h1.astype(jnp.bfloat16), wf_ref[...],
                            preferred_element_type=jnp.float32)

    @pl.when(k == pl.num_programs(1) - 1)
    def _():
        xr = acc_ref[...] + bf_ref[...] + x_ref[...]
        mean = jnp.mean(xr, axis=-1, keepdims=True)
        xc = xr - mean
        var = jnp.mean(xc * xc, axis=-1, keepdims=True)
        inv = jax.lax.rsqrt(var + eps)
        o_ref[...] = (xc * inv * g_ref[...] + be_ref[...]).astype(o_ref.dtype)


def _head_kernel(x_ref, w1_ref, b1_ref, w2_ref, b2_ref, o_ref):
    h = jnp.dot(x_ref[...].astype(jnp.bfloat16), w1_ref[...],
                preferred_element_type=jnp.float32) + b1_ref[...]
    h = jnp.dot(h.astype(jnp.bfloat16), w2_ref[...],
                preferred_element_type=jnp.float32) + b2_ref[...]
    o_ref[...] = jnp.tanh(h).astype(o_ref.dtype)


# ----------------------------------------------------------------------------
# Wrappers around pallas_call
# ----------------------------------------------------------------------------
def pallas_layernorm(x, g, b, eps=1e-12):
    shape = x.shape
    hdim = shape[-1]
    x2 = x.reshape(-1, hdim)
    m = x2.shape[0]
    tm = _row_tile(m)
    x2, mp = _pad_rows(x2, tm)
    out = pl.pallas_call(
        partial(_ln_kernel, eps=eps),
        out_shape=jax.ShapeDtypeStruct((mp, hdim), x.dtype),
        grid=(mp // tm,),
        in_specs=[pl.BlockSpec((tm, hdim), lambda i: (i, 0)),
                  _const_spec((1, hdim)),
                  _const_spec((1, hdim))],
        out_specs=pl.BlockSpec((tm, hdim), lambda i: (i, 0)),
        compiler_params=_cparams(("parallel",)),
    )(x2, g.reshape(1, hdim), b.reshape(1, hdim))
    return out[:m].reshape(shape)


def pallas_attention_layer(x, mask_bias, wqkv, bqkv, wo, bo, g, b, nh, dh, eps=1e-12):
    """One fused call per (layer, batch-example): QKV -> attention -> out-proj + LN."""
    B, S, H = x.shape
    return pl.pallas_call(
        partial(_attn_layer_kernel, nh=nh, dh=dh, eps=eps),
        out_shape=jax.ShapeDtypeStruct((B, S, H), x.dtype),
        grid=(B,),
        in_specs=[pl.BlockSpec((1, S, H), lambda bi: (bi, 0, 0)),
                  pl.BlockSpec((1, 1, S), lambda bi: (bi, 0, 0)),
                  _const_spec((H, 3 * H)),
                  _const_spec((1, 3 * H)),
                  _const_spec((H, H)),
                  _const_spec((1, H)),
                  _const_spec((1, H)),
                  _const_spec((1, H))],
        out_specs=pl.BlockSpec((1, S, H), lambda bi: (bi, 0, 0)),
        compiler_params=_cparams(("parallel",)),
    )(x, mask_bias, wqkv, bqkv.reshape(1, 3 * H), wo, bo.reshape(1, H),
      g.reshape(1, H), b.reshape(1, H))


def pallas_ffn_ln(x, wi, bi, wf, bf_, g, b, eps=1e-12):
    B, S, H = x.shape
    inter = wi.shape[1]
    m = B * S
    x2 = x.reshape(m, H)
    tm = _row_tile(m)
    x2, mp = _pad_rows(x2, tm)

    # Keep the full FFN weights resident (single-buffered) when they fit the VMEM budget,
    # otherwise stream the intermediate dim with a K-reduction grid axis.
    def _est(tk, nbuf):
        return (2 * H * tk * 2 * nbuf        # wi/wf panels (bf16)
                + tm * tk * 6                # h1 f32 + its bf16 cast
                + tm * H * 4 * 5)            # x, out (double-buffered) + f32 accumulator
    tk = inter if _est(inter, 1) <= int(VMEM_LIMIT * 0.6) else _col_tile(inter)
    nk = inter // tk
    if nk == 1:
        wi_spec = _const_spec((H, tk))
        bi_spec = _const_spec((1, tk))
        wf_spec = _const_spec((tk, H))
    else:
        wi_spec = pl.BlockSpec((H, tk), lambda i, k: (0, k))
        bi_spec = pl.BlockSpec((1, tk), lambda i, k: (0, k))
        wf_spec = pl.BlockSpec((tk, H), lambda i, k: (k, 0))

    out = pl.pallas_call(
        partial(_ffn_ln_kernel, eps=eps),
        out_shape=jax.ShapeDtypeStruct((mp, H), x.dtype),
        grid=(mp // tm, nk),
        in_specs=[pl.BlockSpec((tm, H), lambda i, k: (i, 0)),
                  wi_spec, bi_spec, wf_spec,
                  _const_spec((1, H)),
                  _const_spec((1, H)),
                  _const_spec((1, H))],
        out_specs=pl.BlockSpec((tm, H), lambda i, k: (i, 0)),
        scratch_shapes=[pltpu.VMEM((tm, H), jnp.float32)],
        compiler_params=_cparams(("parallel", "arbitrary")),
    )(x2, wi, bi.reshape(1, inter), wf, bf_.reshape(1, H),
      g.reshape(1, H), b.reshape(1, H))
    return out[:m].reshape(B, S, H)


def pallas_head(x, w1, b1, w2, b2):
    # fused fc1 -> fc2 -> tanh on the [CLS] embeddings (tiny; kept in Pallas for coverage).
    m, din = x.shape
    h1 = w1.shape[1]
    h2 = w2.shape[1]
    return pl.pallas_call(
        _head_kernel,
        out_shape=jax.ShapeDtypeStruct((m, h2), x.dtype),
        grid=(1,),
        in_specs=[pl.BlockSpec((m, din), lambda i: (0, 0)),
                  _const_spec((din, h1)),
                  _const_spec((1, h1)),
                  _const_spec((h1, h2)),
                  _const_spec((1, h2))],
        out_specs=pl.BlockSpec((m, h2), lambda i: (0, 0)),
        compiler_params=_cparams(("arbitrary",)),
    )(x, w1, b1.reshape(1, h1), w2, b2.reshape(1, h2))


# ----------------------------------------------------------------------------
# Deterministic synthetic parameters (stands in for the pretrained checkpoint)
# ----------------------------------------------------------------------------
def init_params(key, cfg):
    H, inter = cfg["hidden"], cfg["intermediate"]
    nh = cfg["num_heads"]
    dh = H // nh
    keys = iter(jax.random.split(key, 128))
    bf16 = jnp.bfloat16

    def nrm(shape, std=0.02):
        return std * jax.random.normal(next(keys), shape, dtype=jnp.float32)

    params = {
        "word_emb": nrm((cfg["vocab_size"], H)),
        "pos_emb": nrm((cfg["max_position"], H)),
        "type_emb": nrm((cfg["type_vocab_size"], H)),
        "emb_ln_g": jnp.ones((H,), jnp.float32),
        "emb_ln_b": jnp.zeros((H,), jnp.float32),
        "layers": [],
    }
    # checkpoint-prep step: fold 1/sqrt(dh) into the Q projection (exact in bf16 for dh=4^k)
    qscale = jnp.concatenate([jnp.full((H,), 1.0 / math.sqrt(dh), jnp.float32),
                              jnp.ones((2 * H,), jnp.float32)])
    for _ in range(cfg["num_layers"]):
        wqkv = nrm((H, 3 * H)) * qscale[None, :]          # concatenated [Wq*s | Wk | Wv]
        bqkv = jnp.zeros((3 * H,), jnp.float32) * qscale
        params["layers"].append({
            "wqkv": wqkv.astype(bf16),
            "bqkv": bqkv,
            "wo": nrm((H, H)).astype(bf16),
            "bo": jnp.zeros((H,), jnp.float32),
            "ln1_g": jnp.ones((H,), jnp.float32), "ln1_b": jnp.zeros((H,), jnp.float32),
            "wi": nrm((H, inter)).astype(bf16), "bi": jnp.zeros((inter,), jnp.float32),
            "wf": nrm((inter, H)).astype(bf16), "bf": jnp.zeros((H,), jnp.float32),
            "ln2_g": jnp.ones((H,), jnp.float32), "ln2_b": jnp.zeros((H,), jnp.float32),
        })
    params["fc1_w"] = nrm((H, cfg["hidden_sizes"][0]), std=0.1).astype(bf16)
    params["fc1_b"] = jnp.zeros((cfg["hidden_sizes"][0],), jnp.float32)
    params["fc2_w"] = nrm((cfg["hidden_sizes"][0], cfg["hidden_sizes"][1]), std=0.1).astype(bf16)
    params["fc2_b"] = jnp.zeros((cfg["hidden_sizes"][1],), jnp.float32)
    return params


# ----------------------------------------------------------------------------
# Forward pass  (mirrors BertTextEncoder.forward; dropout is identity in eval mode)
# ----------------------------------------------------------------------------
def bert_text_encoder_forward(params, cfg, input_ids, token_type_ids, attention_mask):
    B, S = input_ids.shape
    H, nh = cfg["hidden"], cfg["num_heads"]
    dh = H // nh

    # embeddings: gathers are plain-JAX glue; LayerNorm is a Pallas kernel
    emb = (jnp.take(params["word_emb"], input_ids, axis=0)
           + jnp.take(params["type_emb"], token_type_ids, axis=0)
           + params["pos_emb"][None, :S, :])
    h = pallas_layernorm(emb, params["emb_ln_g"], params["emb_ln_b"])

    # extended attention mask: (1 - mask) * -10000, shape (B, 1, S)
    mask_bias = ((1.0 - attention_mask.astype(jnp.float32)) * -10000.0)[:, None, :]

    for layer in params["layers"]:
        h = pallas_attention_layer(h, mask_bias, layer["wqkv"], layer["bqkv"],
                                   layer["wo"], layer["bo"],
                                   layer["ln1_g"], layer["ln1_b"], nh, dh)   # (B,S,H) f32
        h = pallas_ffn_ln(h, layer["wi"], layer["bi"], layer["wf"], layer["bf"],
                          layer["ln2_g"], layer["ln2_b"])                    # (B,S,H) f32

    # textEmbeddings = output[0][:, 0, :]  ([CLS] token of last hidden state)
    cls = h[:, 0, :]
    # features = tanh(fc2(fc1(cls)))  -- fused in a single Pallas kernel
    return pallas_head(cls, params["fc1_w"], params["fc1_b"],
                       params["fc2_w"], params["fc2_b"])


# ----------------------------------------------------------------------------
if __name__ == "__main__":
    cfg = dict(
        vocab_size=50,
        type_vocab_size=2,
        max_position=16,
        hidden=32,
        num_heads=2,
        intermediate=64,
        num_layers=2,
        hidden_sizes=(16, 8),
    )

    key = jax.random.PRNGKey(0)
    pkey, ikey = jax.random.split(key)
    params = init_params(pkey, cfg)

    B, S = 2, 8
    input_ids = jax.random.randint(ikey, (B, S), 0, cfg["vocab_size"], dtype=jnp.int32)
    token_type_ids = jnp.zeros((B, S), dtype=jnp.int32)
    # second sequence is padded to length 5 to exercise attention masking
    attention_mask = jnp.array([[1] * S, [1] * 5 + [0] * (S - 5)], dtype=jnp.int32)

    features = bert_text_encoder_forward(params, cfg, input_ids,
                                         token_type_ids, attention_mask)
    features = jax.block_until_ready(features)

    assert features.shape == (B, cfg["hidden_sizes"][1])
    assert bool(jnp.all(jnp.isfinite(features)))
    print("KERNEL_OK")
</pallas_src>

<mosaic_0001>
module attributes {stable_mosaic.version = 11 : i64} {
  func.func @_k(%arg0: i32, %arg1: memref<8x128xf32, #tpu.memory_space<vmem>>, %arg2: memref<8x128xf32, #tpu.memory_space<vmem>>) attributes {dimension_semantics = [#tpu.dimension_semantics<arbitrary>], iteration_bounds = array<i64: 1>, scalar_prefetch = 0 : i64, scratch_operands = 0 : i64, tpu.core_type = #tpu.core_type<tc>, window_params = [{pipeline_mode = #tpu.pipeline_mode<synchronous>, transform_indices = @transform_0, window_bounds = array<i64: 8, 128>}, {pipeline_mode = #tpu.pipeline_mode<synchronous>, transform_indices = @transform_1, window_bounds = array<i64: 8, 128>}]} {
    %c0 = arith.constant 0 : index
    %c0_0 = arith.constant 0 : index
    %0 = vector.load %arg1[%c0, %c0_0] : memref<8x128xf32, #tpu.memory_space<vmem>>, vector<8x128xf32>
    %cst = arith.constant 1.000000e+00 : f32
    %1 = vector.broadcast %cst : f32 to vector<8x128xf32>
    %2 = arith.addf %0, %1 : vector<8x128xf32>
    %c0_1 = arith.constant 0 : index
    %c0_2 = arith.constant 0 : index
    %3 = vector.load %arg2[%c0_1, %c0_2] : memref<8x128xf32, #tpu.memory_space<vmem>>, vector<8x128xf32>
    tpu.vector_store %arg2[%c0_1, %c0_2], %2 {strides = array<i32>} : memref<8x128xf32, #tpu.memory_space<vmem>>, vector<8x128xf32>,
    return
  }
  func.func @transform_0(%arg0: i32) -> (i32, i32) {
    %c0_i32 = arith.constant 0 : i32
    %c0_i32_0 = arith.constant 0 : i32
    %c0_i32_1 = arith.constant 0 : i32
    return %c0_i32, %c0_i32_0 : i32, i32
  }
  func.func @transform_1(%arg0: i32) -> (i32, i32) {
    %c0_i32 = arith.constant 0 : i32
    %c0_i32_0 = arith.constant 0 : i32
    %c0_i32_1 = arith.constant 0 : i32
    return %c0_i32, %c0_i32_0 : i32, i32
  }
}

module attributes {stable_mosaic.version = 11 : i64} {
  func.func @_ln_kernel(%arg0: i32, %arg1: memref<16x32xf32, #tpu.memory_space<vmem>>, %arg2: memref<1x32xf32, #tpu.memory_space<vmem>>, %arg3: memref<1x32xf32, #tpu.memory_space<vmem>>, %arg4: memref<16x32xf32, #tpu.memory_space<vmem>>) attributes {dimension_semantics = [#tpu.dimension_semantics<parallel>], iteration_bounds = array<i64: 1>, scalar_prefetch = 0 : i64, scratch_operands = 0 : i64, tpu.core_type = #tpu.core_type<tc>, window_params = [{transform_indices = @transform_0, window_bounds = array<i64: 16, 32>}, {pipeline_mode = #tpu.pipeline_mode<synchronous>, transform_indices = @transform_1, window_bounds = array<i64: 1, 32>}, {pipeline_mode = #tpu.pipeline_mode<synchronous>, transform_indices = @transform_2, window_bounds = array<i64: 1, 32>}, {transform_indices = @transform_3, window_bounds = array<i64: 16, 32>}]} {
    %c0 = arith.constant 0 : index
    %c0_0 = arith.constant 0 : index
    %0 = vector.load %arg1[%c0, %c0_0] : memref<16x32xf32, #tpu.memory_space<vmem>>, vector<16x32xf32>
    %cst = arith.constant dense<0.000000e+00> : vector<16xf32>
    %1 = vector.multi_reduction <add>, %0, %cst [1] : vector<16x32xf32> to vector<16xf32>
    %2 = vector.shape_cast %1 : vector<16xf32> to vector<16x1xf32>
    %cst_1 = arith.constant 3.200000e+01 : f32
    %3 = vector.broadcast %cst_1 : f32 to vector<16x1xf32>
    %4 = arith.divf %2, %3 : vector<16x1xf32>
    %5 = vector.broadcast %4 : vector<16x1xf32> to vector<16x32xf32>
    %6 = arith.subf %0, %5 : vector<16x32xf32>
    %7 = arith.mulf %6, %6 : vector<16x32xf32>
    %cst_2 = arith.constant dense<0.000000e+00> : vector<16xf32>
    %8 = vector.multi_reduction <add>, %7, %cst_2 [1] : vector<16x32xf32> to vector<16xf32>
    %9 = vector.shape_cast %8 : vector<16xf32> to vector<16x1xf32>
    %cst_3 = arith.constant 3.200000e+01 : f32
    %10 = vector.broadcast %cst_3 : f32 to vector<16x1xf32>
    %11 = arith.divf %9, %10 : vector<16x1xf32>
    %cst_4 = arith.constant 9.99999996E-13 : f32
    %12 = vector.broadcast %cst_4 : f32 to vector<16x1xf32>
    %13 = arith.addf %11, %12 : vector<16x1xf32>
    %14 = math.rsqrt %13 : vector<16x1xf32>
    %15 = vector.broadcast %14 : vector<16x1xf32> to vector<16x32xf32>
    %16 = arith.mulf %6, %15 : vector<16x32xf32>
    %c0_5 = arith.constant 0 : index
    %c0_6 = arith.constant 0 : index
    %17 = vector.load %arg2[%c0_5, %c0_6] : memref<1x32xf32, #tpu.memory_space<vmem>>, vector<1x32xf32>
    %18 = vector.broadcast %17 : vector<1x32xf32> to vector<16x32xf32>
    %19 = arith.mulf %16, %18 : vector<16x32xf32>
    %c0_7 = arith.constant 0 : index
    %c0_8 = arith.constant 0 : index
    %20 = vector.load %arg3[%c0_7, %c0_8] : memref<1x32xf32, #tpu.memory_space<vmem>>, vector<1x32xf32>
    %21 = vector.broadcast %20 : vector<1x32xf32> to vector<16x32xf32>
    %22 = arith.addf %19, %21 : vector<16x32xf32>
    %c0_9 = arith.constant 0 : index
    %c0_10 = arith.constant 0 : index
    %23 = vector.load %arg4[%c0_9, %c0_10] : memref<16x32xf32, #tpu.memory_space<vmem>>, vector<16x32xf32>
    tpu.vector_store %arg4[%c0_9, %c0_10], %22 {strides = array<i32>} : memref<16x32xf32, #tpu.memory_space<vmem>>, vector<16x32xf32>,
    return
  }
  func.func @transform_0(%arg0: i32) -> (i32, i32) {
    %c0_i32 = arith.constant 0 : i32
    %c0_i32_0 = arith.constant 0 : i32
    return %arg0, %c0_i32 : i32, i32
  }
  func.func @transform_1(%arg0: i32) -> (i32, i32) {
    %c0_i32 = arith.constant 0 : i32
    %c0_i32_0 = arith.constant 0 : i32
    %c0_i32_1 = arith.constant 0 : i32
    return %c0_i32, %c0_i32_0 : i32, i32
  }
  func.func @transform_2(%arg0: i32) -> (i32, i32) {
    %c0_i32 = arith.constant 0 : i32
    %c0_i32_0 = arith.constant 0 : i32
    %c0_i32_1 = arith.constant 0 : i32
    return %c0_i32, %c0_i32_0 : i32, i32
  }
  func.func @transform_3(%arg0: i32) -> (i32, i32) {
    %c0_i32 = arith.constant 0 : i32
    %c0_i32_0 = arith.constant 0 : i32
    return %arg0, %c0_i32 : i32, i32
  }
}

</mosaic_0001>

<bundles_post_ra>
// kernel: tpu_custom_call.1
= control target key start
LH: loop header
LB: loop body
LE: loop exit
PB: predicated region body
PF: predicated region fallthrough
CT: control target
= control target key end

     0   :  { %6 = vsyncpa [#allocation3], 0  ;;  %s125_s0 = inlined_call_operand.hbm [shape: f32[8,128], index: 0, kind: input, shape index: {}]   ;;  %s126_s1 = inlined_call_operand.hbm [shape: f32[8,128], index: 1, kind: output, shape index: {}]  }
   0x1   :  { %7 = vsyncpa [#allocation4], 0  ;;  %s89_s6 = smov [#allocation2]   ;;  %s41_s10 = scalar_lea.hbm %s125_s0, 128 }
   0x2   :  { %s14_s7 = sshll.u32 %s89_s6, 4  ;;  %p42_p0 = scmp.ne.s32.totalorder %s125_s0, %s41_s10  ;;  %s15_s7 = int_to_ptr.vmem [resolvable:$true] %s14_s7 }
   0x3   :  { %p45_p1 = scmp.lt.u32.totalorder %s41_s10, %s125_s0 }
   0x5   :  { %p47_p2 = pnand %p45_p1, %p42_p0 }
   0x7   :  { %50 = shalt.err (!%p47_p2)
}
   0x8   :  { %s51_s15 = scalar_lea.vmem %s15_s7, 128  ;;  %p56_p4 = scmp.lt.s32.totalorder %s15_s7, %s15_s7 }
   0x9   :  { %p52_p3 = scmp.ne.s32.totalorder %s15_s7, %s51_s15  ;;  %p57_p5 = scmp.lt.s32.totalorder %s51_s15, %s51_s15 }
   0xb   :  { %p58_p6 = por %p57_p5, %p56_p4 }
   0xd   :  { %p59_p7 = pnand %p58_p6, %p52_p3 }
   0xf   :  { %62 = shalt.err (!%p59_p7)
}
  0x10   :  { %17 = dma.hbm_to_vmem [thread:$0]  %s125_s0, 128, %s15_s7, [#allocation3]  }
  0x11   :  { %85 = dma.done.wait [#allocation3], 128  }
  0x12   :  { %86 = vsyncadd [#allocation3], 4294967168  ;;  %s90_s18 = smov [#allocation5]   ;;  %v21_v0 = vld [vmem:[#allocation2] sm:$0xff] }
  0x13   :  { %s30_s19 = sshll.u32 %s90_s18, 4  ;;  %v22_v1 = vadd.f32 1.0, %v21_v0  ;;  %s31_s19 = int_to_ptr.vmem [resolvable:$true] %s30_s19 }
  0x14   :  { %s63_s20 = scalar_lea.vmem %s31_s19, 128  ;;  %p68_p9 = scmp.lt.s32.totalorder %s31_s19, %s31_s19 }
  0x15   :  { %23 = vst [vmem:[#allocation5] sm:$0xff] %v22_v1  ;;  %p64_p8 = scmp.ne.s32.totalorder %s31_s19, %s63_s20  ;;  %p69_p10 = scmp.lt.s32.totalorder %s63_s20, %s63_s20 }
  0x17   :  { %p70_p11 = por %p69_p10, %p68_p9 }
  0x19   :  { %p71_p12 = pnand %p70_p11, %p64_p8 }
  0x1b   :  { %74 = shalt.err (!%p71_p12)
}
  0x1c   :  { %s75_s23 = scalar_lea.hbm %s126_s1, 128 }
  0x1d   :  { %p76_p13 = scmp.ne.s32.totalorder %s126_s1, %s75_s23  ;;  %p79_p0 = scmp.lt.u32.totalorder %s75_s23, %s126_s1 }
  0x1f   :  { %p81_p1 = pnand %p79_p0, %p76_p13 }
  0x21   :  { %84 = shalt.err (!%p81_p1)
}
  0x22   :  { %33 = dma.vmem_to_hbm [thread:$0]  %s31_s19, 128, %s126_s1, [#allocation4]  }
  0x23   :  { %87 = dma.done.wait [#allocation4], 128  }
  0x24   :  { %88 = vsyncadd [#allocation4], 4294967168 }
  0x25   :  { %37 = vsyncpa [#allocation3], 1 }
  0x26   :  { %38 = vsyncpa [#allocation4], 1 }

// kernel: tpu_custom_call.1
= control target key start
LH: loop header
LB: loop body
LE: loop exit
PB: predicated region body
PF: predicated region fallthrough
CT: control target
= control target key end

     0   :  { %8 = vsyncpa [#allocation3], 0  ;;  %s220_s0 = inlined_call_operand.hbm [shape: f32[16,32], index: 0, kind: input, shape index: {}]   ;;  %s221_s1 = inlined_call_operand.vmem [shape: f32[1,32], index: 1, kind: input, shape index: {}]   ;;  %s222_s2 = inlined_call_operand.vmem [shape: f32[1,32], index: 2, kind: input, shape index: {}]   ;;  %s223_s3 = inlined_call_operand.hbm [shape: f32[16,32], index: 3, kind: output, shape index: {}]  }
   0x1   :  { %9 = vsyncpa [#allocation4], 0  ;;  %s154_s12 = smov [#allocation2]   ;;  %s106_s16 = scalar_lea.hbm %s220_s0, 256 }
   0x2   :  { %s15_s13 = sshll.u32 %s154_s12, 4  ;;  %p107_p0 = scmp.ne.s32.totalorder %s220_s0, %s106_s16  ;;  %s16_s13 = int_to_ptr.vmem [resolvable:$true] %s15_s13 }
   0x3   :  { %p110_p1 = scmp.lt.u32.totalorder %s106_s16, %s220_s0 }
   0x5   :  { %p112_p2 = pnand %p110_p1, %p107_p0 }
   0x7   :  { %115 = shalt.err (!%p112_p2)
}
   0x8   :  { %s116_s21 = scalar_lea.vmem %s16_s13, 256  ;;  %p121_p4 = scmp.lt.s32.totalorder %s16_s13, %s16_s13 }
   0x9   :  { %p117_p3 = scmp.ne.s32.totalorder %s16_s13, %s116_s21  ;;  %p122_p5 = scmp.lt.s32.totalorder %s116_s21, %s116_s21 }
   0xb   :  { %p123_p6 = por %p122_p5, %p121_p4 }
   0xd   :  { %p124_p7 = pnand %p123_p6, %p117_p3 }
   0xf   :  { %127 = shalt.err (!%p124_p7)
}
  0x10   :  { %s155_s22 = smov 128   ;;  %s156_s23 = smov 8  }
  0x11   :  { %21 = dma.hbm_to_vmem [thread:$0]  %s220_s0, 256, %s16_s13, [#allocation3], %s155_s22, %s155_s22, %s156_s23  }
  0x12   :  { %150 = dma.done.wait [#allocation3], 256  }
  0x13   :  { %151 = vsyncadd [#allocation3], 4294967040  ;;  %vm31_vm0 = vcmask 261120   ;;  %v29_v0 = vld [vmem:[#allocation2] sm:$0xff]  ;;  %v30_v1 = vld [vmem:[#allocation2 + $0x8] sm:$0xff]  ;;  %s157_s29 = smov [#allocation5]  }
  0x14   :  { %v32_v2 = vsel %vm31_vm0, %v29_v0, 0.0  ;;  %v35_v3 = vsel %vm31_vm0, %v30_v1, 0.0  ;;  %v96_v21 = vld [vmem:[%s221_s1] ss:$0 sm:$0xff]  ;;  %s84_s30 = sshll.u32 %s157_s29, 4  ;;  %s85_s30 = int_to_ptr.vmem [resolvable:$true] %s84_s30 }
  0x15   :  { %33 = vadd.xlane.f32.xlu0 %v32_v2  ;;  %v97_v23 = vld [vmem:[%s222_s2] ss:$0 sm:$0xff]  ;;  %s128_s4 = scalar_lea.vmem %s85_s30, 256  ;;  %p133_p9 = scmp.lt.s32.totalorder %s85_s30, %s85_s30 }
  0x16   :  { %p129_p8 = scmp.ne.s32.totalorder %s85_s30, %s128_s4  ;;  %p134_p10 = scmp.lt.s32.totalorder %s128_s4, %s128_s4 }
  0x18   :  { %p135_p11 = por %p134_p10, %p133_p9 }
  0x19   :  { %36 = vadd.xlane.f32.xlu0 %v35_v3 }
  0x1a   :  { %p136_p12 = pnand %p135_p11, %p129_p8 }
  0xa2   :  { %v34_v4 = vpop.xlane.xlu0 %33 }
  0xa3   :  { %v39_v5 = vmul.f32 0.03125, %v34_v4 }
  0xa5   :  { %v41_v6 = vsub.f32 %v29_v0, %v39_v5 }
  0xa6   :  { %v37_v7 = vpop.xlane.xlu0 %36 }
  0xa7   :  { %v40_v8 = vmul.f32 0.03125, %v37_v7  ;;  %v43_v9 = vmul.f32 %v41_v6, %v41_v6 }
  0xa9   :  { %v42_v10 = vsub.f32 %v30_v1, %v40_v8  ;;  %v45_v11 = vsel %vm31_vm0, %v43_v9, 0.0 }
  0xaa   :  { %46 = vadd.xlane.f32.xlu1 %v45_v11 }
  0xab   :  { %v44_v12 = vmul.f32 %v42_v10, %v42_v10 }
  0xad   :  { %v48_v13 = vsel %vm31_vm0, %v44_v12, 0.0 }
  0xae   :  { %49 = vadd.xlane.f32.xlu1 %v48_v13 }
 0x137   :  { %v47_v14 = vpop.xlane.xlu1 %46 }
 0x138   :  { %v51_v15 = vmul.f32 0.03125, %v47_v14 }
 0x13a   :  { %v53_v16 = vadd.f32 1e-12, %v51_v15 }
 0x13b   :  { %v50_v17 = vpop.xlane.xlu1 %49 }
 0x13c   :  { %102 = vrsqrt.f32 %v53_v16  ;;  %v52_v18 = vmul.f32 0.03125, %v50_v17 }
 0x13e   :  { %v54_v19 = vadd.f32 1e-12, %v52_v18 }
 0x140   :  { %104 = vrsqrt.f32 %v54_v19 }
 0x146   :  { %v103_v20 = vpop.eup %102 }
 0x147   :  { %v57_v22 = vmul.f32 %v103_v20, %v41_v6 }
 0x149   :  { %v66_v24 = vmul.f32 %v96_v21, %v57_v22 }
 0x14a   :  { %v105_v25 = vpop.eup %104 }
 0x14b   :  { %v58_v26 = vmul.f32 %v105_v25, %v42_v10  ;;  %v75_v27 = vadd.f32 %v97_v23, %v66_v24 }
 0x14d   :  { %v67_v28 = vmul.f32 %v96_v21, %v58_v26  ;;  %77 = vst.msk [vmem:[#allocation5] sm:$0xff] %vm31_vm0, %v75_v27 }
 0x14f   :  { %v76_v29 = vadd.f32 %v97_v23, %v67_v28 }
 0x151   :  { %78 = vst.msk [vmem:[#allocation5 + $0x8] sm:$0xff] %vm31_vm0, %v76_v29 }
 0x152   :  { %139 = shalt.err (!%p136_p12)
}
 0x153   :  { %s140_s5 = scalar_lea.hbm %s223_s3, 256 }
 0x154   :  { %p141_p13 = scmp.ne.s32.totalorder %s223_s3, %s140_s5  ;;  %p144_p0 = scmp.lt.u32.totalorder %s140_s5, %s223_s3 }
 0x156   :  { %p146_p1 = pnand %p144_p0, %p141_p13 }
 0x158   :  { %149 = shalt.err (!%p146_p1)
}
 0x159   :  { %90 = dma.vmem_to_hbm [thread:$0]  %s85_s30, 256, %s223_s3, [#allocation4], %s155_s22, %s155_s22, %s156_s23  }
 0x15a   :  { %152 = dma.done.wait [#allocation4], 256  }
 0x15b   :  { %153 = vsyncadd [#allocation4], 4294967040 }
 0x15c   :  { %94 = vsyncpa [#allocation3], 1 }
 0x15d   :  { %95 = vsyncpa [#allocation4], 1 }

</bundles_post_ra>
